<compile_context>
chip_gen: v7x
topology: tpu7x:2x2x1
jax: 0.10.0
libtpu: 0.0.40
codegen_flags: <defaults>
</compile_context>

<pallas_src>
import jax
import jax.numpy as jnp
from jax.experimental import pallas as pl
from jax.experimental.pallas import tpu as pltpu

_LANES = 128     # vreg lane width   -> hidden-dim padding target
_SUBLANES = 8    # vreg sublane width -> batch-tile multiple


def _round_up(n, m):
    return ((n + m - 1) // m) * m


# --------------------------------------------------------------------------- #
# Kernel                                                                      #
# --------------------------------------------------------------------------- #
def _mlp_kernel(x_ref,
                w1_ref, b1_ref,
                w2_ref, b2_ref,
                w3_ref, b3_ref,
                w4_ref, b4_ref,
                w5_ref, b5_ref,
                w6_ref, b6_ref,
                o_ref):
    """Fused 6-layer MLP: (Linear + ReLU) x 5, then Linear.

    x_ref is f32 (batch_tile, in_dim) and is cast to the weight dtype (bf16 by
    default) in-register; matmuls accumulate in f32 on the MXU; biases are f32;
    hidden activations are re-cast to the compute dtype between layers; the
    final result is stored f32 into a narrow (batch_tile, out_dim) block.
    """
    compute_dtype = w1_ref.dtype

    def dense(h, w_ref, b_ref):
        return jnp.dot(h, w_ref[...], preferred_element_type=jnp.float32) + b_ref[...]

    def dense_relu(h, w_ref, b_ref):
        return jnp.maximum(dense(h, w_ref, b_ref), 0.0).astype(compute_dtype)

    h = x_ref[...].astype(compute_dtype)
    h = dense_relu(h, w1_ref, b1_ref)
    h = dense_relu(h, w2_ref, b2_ref)
    h = dense_relu(h, w3_ref, b3_ref)
    h = dense_relu(h, w4_ref, b4_ref)
    h = dense_relu(h, w5_ref, b5_ref)
    # final layer: Linear only (no ReLU), narrow f32 result
    o_ref[...] = dense(h, w6_ref, b6_ref).astype(o_ref.dtype)


# --------------------------------------------------------------------------- #
# Parameter preparation (done ONCE, outside the per-call path)                #
# --------------------------------------------------------------------------- #
def prepare_params(params, compute_dtype=jnp.bfloat16):
    """Pad hidden feature dims to 128 lanes, cast weights to compute_dtype.

    params: list of 6 (W, b); W shape (fan_in, fan_out), b shape (fan_out,) or
    (1, fan_out).  The first layer's fan_in and the last layer's fan_out are
    left unpadded (they match the streamed x / out arrays).  Padded rows/cols
    are exactly zero, so ReLU(0)=0 keeps the padding inert through all layers.
    """
    n = len(params)
    prepared = []
    prev = int(params[0][0].shape[0])                 # == in_dim, unpadded
    for i, (w, b) in enumerate(params):
        fi, fo = int(w.shape[0]), int(w.shape[1])
        fo_pad = fo if i == n - 1 else _round_up(fo, _LANES)
        w_p = jnp.zeros((prev, fo_pad), compute_dtype).at[:fi, :fo].set(
            w.astype(compute_dtype))
        b_p = jnp.zeros((1, fo_pad), jnp.float32).at[:, :fo].set(
            jnp.reshape(b, (1, -1)).astype(jnp.float32))
        prepared.append((w_p, b_p))
        prev = fo_pad
    return prepared


# --------------------------------------------------------------------------- #
# Forward wrapper                                                             #
# --------------------------------------------------------------------------- #
def model_regv4_forward(x, prepared_params, *, batch_tile=None,
                        target_batch_tile=2048, vmem_limit_bytes=None):
    """Run the fused MLP Pallas kernel.

    x:               (B, in_dim) float32 (passed to the kernel unpadded/uncast)
    prepared_params: output of prepare_params()
    """
    B, in_dim = x.shape
    assert int(prepared_params[0][0].shape[0]) == in_dim, "in_dim mismatch"
    out_dim = int(prepared_params[-1][0].shape[1])

    # ---- batch tiling ------------------------------------------------------
    # Pad B only to a multiple of 8, then pick a tile (<= target, multiple of
    # 8) via ceil-div so the grid has >= 2 steps whenever B >= 16 (both v7x
    # TensorCores get work) and tail waste stays < 8 rows per grid step.
    B8 = _round_up(B, _SUBLANES)
    if batch_tile is None:
        if B8 <= _SUBLANES:
            batch_tile = _SUBLANES
        else:
            n_tiles = max(2, pl.cdiv(B8, target_batch_tile))
            batch_tile = _round_up(pl.cdiv(B8, n_tiles), _SUBLANES)
    assert batch_tile % _SUBLANES == 0, "batch_tile must be a multiple of 8"
    grid_b = pl.cdiv(B8, batch_tile)
    B_total = grid_b * batch_tile

    x_in = x if B_total == B else jnp.pad(x, ((0, B_total - B), (0, 0)))

    # ---- specs: x/out tiled over batch; weights/biases whole in VMEM --------
    in_specs = [pl.BlockSpec((batch_tile, in_dim), lambda i: (i, 0))]
    flat_args = [x_in]
    for (w_p, b_p) in prepared_params:
        in_specs.append(pl.BlockSpec(memory_space=pltpu.MemorySpace.VMEM))
        in_specs.append(pl.BlockSpec(memory_space=pltpu.MemorySpace.VMEM))
        flat_args.extend([w_p, b_p])

    out_specs = pl.BlockSpec((batch_tile, out_dim), lambda i: (i, 0))

    # ---- cost estimate (padded MXU flops; streamed + resident bytes) --------
    flops = 2 * B_total * sum(int(w.shape[0]) * int(w.shape[1])
                              for w, _ in prepared_params)
    bytes_accessed = (x_in.size * x_in.dtype.itemsize
                      + B_total * out_dim * 4
                      + sum(w.size * w.dtype.itemsize + b.size * b.dtype.itemsize
                            for w, b in prepared_params))
    cost = pl.CostEstimate(flops=int(flops), transcendentals=0,
                           bytes_accessed=int(bytes_accessed))

    cp_kwargs = dict(dimension_semantics=("parallel",))
    if vmem_limit_bytes is not None:
        cp_kwargs["vmem_limit_bytes"] = vmem_limit_bytes

    y = pl.pallas_call(
        _mlp_kernel,
        grid=(grid_b,),
        in_specs=in_specs,
        out_specs=out_specs,
        out_shape=jax.ShapeDtypeStruct((B_total, out_dim), jnp.float32),
        compiler_params=pltpu.CompilerParams(**cp_kwargs),
        cost_estimate=cost,
    )(*flat_args)

    # strip batch padding only (no column slice: output is already narrow)
    return y if B_total == B else y[:B]


# --------------------------------------------------------------------------- #
# Init + reference                                                            #
# --------------------------------------------------------------------------- #
def init_params(input_dim, output_dim, key):
    """Deterministic init mimicking PyTorch nn.Linear default
    (uniform(-1/sqrt(fan_in), 1/sqrt(fan_in)) for both W and b).
    Weights stored as (in_features, out_features)."""
    dims = [
        (input_dim, input_dim + 20),
        (input_dim + 20, input_dim + 10),
        (input_dim + 10, input_dim),
        (input_dim, input_dim // 2),
        (input_dim // 2, input_dim // 4),
        (input_dim // 4, output_dim),
    ]
    params = []
    for (fan_in, fan_out) in dims:
        key, kw, kb = jax.random.split(key, 3)
        bound = 1.0 / jnp.sqrt(jnp.float32(fan_in))
        w = jax.random.uniform(kw, (fan_in, fan_out), jnp.float32, -bound, bound)
        b = jax.random.uniform(kb, (1, fan_out), jnp.float32, -bound, bound)
        params.append((w, b))
    return params


def reference_forward(x, params, compute_dtype=jnp.bfloat16):
    """Pure-JAX reference mirroring the kernel numerics: compute_dtype
    inputs/weights/hidden activations, f32 accumulation and biases."""
    h = x.astype(compute_dtype)
    n = len(params)
    for i, (w, b) in enumerate(params):
        acc = jnp.dot(h, w.astype(compute_dtype),
                      preferred_element_type=jnp.float32) + jnp.reshape(b, (1, -1))
        if i < n - 1:
            h = jnp.maximum(acc, 0.0).astype(compute_dtype)
        else:
            h = acc
    return h


if __name__ == "__main__":
    input_dim = 32
    output_dim = 4
    batch = 8

    key = jax.random.PRNGKey(0)
    key, kx = jax.random.split(key)
    x = jax.random.normal(kx, (batch, input_dim), dtype=jnp.float32)
    params = init_params(input_dim, output_dim, key)

    prepared = prepare_params(params)            # pad + cast ONCE, outside jit
    forward = jax.jit(model_regv4_forward)

    out = jax.block_until_ready(forward(x, prepared))

    ref = reference_forward(x, params)
    assert out.shape == (batch, output_dim)
    max_err = float(jnp.max(jnp.abs(out - ref)))
    assert jnp.allclose(out, ref, atol=1e-2, rtol=1e-2), (
        f"mismatch vs reference (max |err|={max_err})")

    print("KERNEL_OK")
</pallas_src>

<mosaic_0001>
module attributes {stable_mosaic.version = 11 : i64} {
  func.func @_mlp_kernel(%arg0: i32, %arg1: memref<8x32xf32, #tpu.memory_space<vmem>>, %arg2: memref<32x128xbf16, #tpu.memory_space<vmem>>, %arg3: memref<1x128xf32, #tpu.memory_space<vmem>>, %arg4: memref<128x128xbf16, #tpu.memory_space<vmem>>, %arg5: memref<1x128xf32, #tpu.memory_space<vmem>>, %arg6: memref<128x128xbf16, #tpu.memory_space<vmem>>, %arg7: memref<1x128xf32, #tpu.memory_space<vmem>>, %arg8: memref<128x128xbf16, #tpu.memory_space<vmem>>, %arg9: memref<1x128xf32, #tpu.memory_space<vmem>>, %arg10: memref<128x128xbf16, #tpu.memory_space<vmem>>, %arg11: memref<1x128xf32, #tpu.memory_space<vmem>>, %arg12: memref<128x4xbf16, #tpu.memory_space<vmem>>, %arg13: memref<1x4xf32, #tpu.memory_space<vmem>>, %arg14: memref<8x4xf32, #tpu.memory_space<vmem>>) attributes {dimension_semantics = [#tpu.dimension_semantics<parallel>], iteration_bounds = array<i64: 1>, scalar_prefetch = 0 : i64, scratch_operands = 0 : i64, tpu.core_type = #tpu.core_type<tc>, window_params = [{transform_indices = @transform_0, window_bounds = array<i64: 8, 32>}, {pipeline_mode = #tpu.pipeline_mode<synchronous>, transform_indices = @transform_1, window_bounds = array<i64: 32, 128>}, {pipeline_mode = #tpu.pipeline_mode<synchronous>, transform_indices = @transform_2, window_bounds = array<i64: 1, 128>}, {pipeline_mode = #tpu.pipeline_mode<synchronous>, transform_indices = @transform_3, window_bounds = array<i64: 128, 128>}, {pipeline_mode = #tpu.pipeline_mode<synchronous>, transform_indices = @transform_4, window_bounds = array<i64: 1, 128>}, {pipeline_mode = #tpu.pipeline_mode<synchronous>, transform_indices = @transform_5, window_bounds = array<i64: 128, 128>}, {pipeline_mode = #tpu.pipeline_mode<synchronous>, transform_indices = @transform_6, window_bounds = array<i64: 1, 128>}, {pipeline_mode = #tpu.pipeline_mode<synchronous>, transform_indices = @transform_7, window_bounds = array<i64: 128, 128>}, {pipeline_mode = #tpu.pipeline_mode<synchronous>, transform_indices = @transform_8, window_bounds = array<i64: 1, 128>}, {pipeline_mode = #tpu.pipeline_mode<synchronous>, transform_indices = @transform_9, window_bounds = array<i64: 128, 128>}, {pipeline_mode = #tpu.pipeline_mode<synchronous>, transform_indices = @transform_10, window_bounds = array<i64: 1, 128>}, {pipeline_mode = #tpu.pipeline_mode<synchronous>, transform_indices = @transform_11, window_bounds = array<i64: 128, 4>}, {pipeline_mode = #tpu.pipeline_mode<synchronous>, transform_indices = @transform_12, window_bounds = array<i64: 1, 4>}, {transform_indices = @transform_13, window_bounds = array<i64: 8, 4>}]} {
    %c0 = arith.constant 0 : index
    %c0_0 = arith.constant 0 : index
    %0 = vector.load %arg1[%c0, %c0_0] : memref<8x32xf32, #tpu.memory_space<vmem>>, vector<8x32xf32>
    %1 = arith.truncf %0 : vector<8x32xf32> to vector<8x32xbf16>
    %c0_1 = arith.constant 0 : index
    %c0_2 = arith.constant 0 : index
    %2 = vector.load %arg2[%c0_1, %c0_2] : memref<32x128xbf16, #tpu.memory_space<vmem>>, vector<32x128xbf16>
    %cst = arith.constant dense<0.000000e+00> : vector<8x128xf32>
    %3 = tpu.matmul %1, %2, %cst {dimension_numbers = #tpu.dot_dimension_numbers<[1], [0], [0], [1], [0, 0, 1, 1], [], []>} : vector<8x32xbf16>, vector<32x128xbf16>, vector<8x128xf32> -> vector<8x128xf32>
    %c0_3 = arith.constant 0 : index
    %c0_4 = arith.constant 0 : index
    %4 = vector.load %arg3[%c0_3, %c0_4] : memref<1x128xf32, #tpu.memory_space<vmem>>, vector<1x128xf32>
    %5 = vector.broadcast %4 : vector<1x128xf32> to vector<8x128xf32>
    %6 = arith.addf %3, %5 : vector<8x128xf32>
    %cst_5 = arith.constant 0.000000e+00 : f32
    %7 = vector.broadcast %cst_5 : f32 to vector<8x128xf32>
    %8 = arith.maximumf %6, %7 : vector<8x128xf32>
    %9 = arith.truncf %8 : vector<8x128xf32> to vector<8x128xbf16>
    %c0_6 = arith.constant 0 : index
    %c0_7 = arith.constant 0 : index
    %10 = vector.load %arg4[%c0_6, %c0_7] : memref<128x128xbf16, #tpu.memory_space<vmem>>, vector<128x128xbf16>
    %cst_8 = arith.constant dense<0.000000e+00> : vector<8x128xf32>
    %11 = tpu.matmul %9, %10, %cst_8 {dimension_numbers = #tpu.dot_dimension_numbers<[1], [0], [0], [1], [0, 0, 1, 1], [], []>} : vector<8x128xbf16>, vector<128x128xbf16>, vector<8x128xf32> -> vector<8x128xf32>
    %c0_9 = arith.constant 0 : index
    %c0_10 = arith.constant 0 : index
    %12 = vector.load %arg5[%c0_9, %c0_10] : memref<1x128xf32, #tpu.memory_space<vmem>>, vector<1x128xf32>
    %13 = vector.broadcast %12 : vector<1x128xf32> to vector<8x128xf32>
    %14 = arith.addf %11, %13 : vector<8x128xf32>
    %cst_11 = arith.constant 0.000000e+00 : f32
    %15 = vector.broadcast %cst_11 : f32 to vector<8x128xf32>
    %16 = arith.maximumf %14, %15 : vector<8x128xf32>
    %17 = arith.truncf %16 : vector<8x128xf32> to vector<8x128xbf16>
    %c0_12 = arith.constant 0 : index
    %c0_13 = arith.constant 0 : index
    %18 = vector.load %arg6[%c0_12, %c0_13] : memref<128x128xbf16, #tpu.memory_space<vmem>>, vector<128x128xbf16>
    %cst_14 = arith.constant dense<0.000000e+00> : vector<8x128xf32>
    %19 = tpu.matmul %17, %18, %cst_14 {dimension_numbers = #tpu.dot_dimension_numbers<[1], [0], [0], [1], [0, 0, 1, 1], [], []>} : vector<8x128xbf16>, vector<128x128xbf16>, vector<8x128xf32> -> vector<8x128xf32>
    %c0_15 = arith.constant 0 : index
    %c0_16 = arith.constant 0 : index
    %20 = vector.load %arg7[%c0_15, %c0_16] : memref<1x128xf32, #tpu.memory_space<vmem>>, vector<1x128xf32>
    %21 = vector.broadcast %20 : vector<1x128xf32> to vector<8x128xf32>
    %22 = arith.addf %19, %21 : vector<8x128xf32>
    %cst_17 = arith.constant 0.000000e+00 : f32
    %23 = vector.broadcast %cst_17 : f32 to vector<8x128xf32>
    %24 = arith.maximumf %22, %23 : vector<8x128xf32>
    %25 = arith.truncf %24 : vector<8x128xf32> to vector<8x128xbf16>
    %c0_18 = arith.constant 0 : index
    %c0_19 = arith.constant 0 : index
    %26 = vector.load %arg8[%c0_18, %c0_19] : memref<128x128xbf16, #tpu.memory_space<vmem>>, vector<128x128xbf16>
    %cst_20 = arith.constant dense<0.000000e+00> : vector<8x128xf32>
    %27 = tpu.matmul %25, %26, %cst_20 {dimension_numbers = #tpu.dot_dimension_numbers<[1], [0], [0], [1], [0, 0, 1, 1], [], []>} : vector<8x128xbf16>, vector<128x128xbf16>, vector<8x128xf32> -> vector<8x128xf32>
    %c0_21 = arith.constant 0 : index
    %c0_22 = arith.constant 0 : index
    %28 = vector.load %arg9[%c0_21, %c0_22] : memref<1x128xf32, #tpu.memory_space<vmem>>, vector<1x128xf32>
    %29 = vector.broadcast %28 : vector<1x128xf32> to vector<8x128xf32>
    %30 = arith.addf %27, %29 : vector<8x128xf32>
    %cst_23 = arith.constant 0.000000e+00 : f32
    %31 = vector.broadcast %cst_23 : f32 to vector<8x128xf32>
    %32 = arith.maximumf %30, %31 : vector<8x128xf32>
    %33 = arith.truncf %32 : vector<8x128xf32> to vector<8x128xbf16>
    %c0_24 = arith.constant 0 : index
    %c0_25 = arith.constant 0 : index
    %34 = vector.load %arg10[%c0_24, %c0_25] : memref<128x128xbf16, #tpu.memory_space<vmem>>, vector<128x128xbf16>
    %cst_26 = arith.constant dense<0.000000e+00> : vector<8x128xf32>
    %35 = tpu.matmul %33, %34, %cst_26 {dimension_numbers = #tpu.dot_dimension_numbers<[1], [0], [0], [1], [0, 0, 1, 1], [], []>} : vector<8x128xbf16>, vector<128x128xbf16>, vector<8x128xf32> -> vector<8x128xf32>
    %c0_27 = arith.constant 0 : index
    %c0_28 = arith.constant 0 : index
    %36 = vector.load %arg11[%c0_27, %c0_28] : memref<1x128xf32, #tpu.memory_space<vmem>>, vector<1x128xf32>
    %37 = vector.broadcast %36 : vector<1x128xf32> to vector<8x128xf32>
    %38 = arith.addf %35, %37 : vector<8x128xf32>
    %cst_29 = arith.constant 0.000000e+00 : f32
    %39 = vector.broadcast %cst_29 : f32 to vector<8x128xf32>
    %40 = arith.maximumf %38, %39 : vector<8x128xf32>
    %41 = arith.truncf %40 : vector<8x128xf32> to vector<8x128xbf16>
    %c0_30 = arith.constant 0 : index
    %c0_31 = arith.constant 0 : index
    %42 = vector.load %arg12[%c0_30, %c0_31] : memref<128x4xbf16, #tpu.memory_space<vmem>>, vector<128x4xbf16>
    %cst_32 = arith.constant dense<0.000000e+00> : vector<8x4xf32>
    %43 = tpu.matmul %41, %42, %cst_32 {dimension_numbers = #tpu.dot_dimension_numbers<[1], [0], [0], [1], [0, 0, 1, 1], [], []>} : vector<8x128xbf16>, vector<128x4xbf16>, vector<8x4xf32> -> vector<8x4xf32>
    %c0_33 = arith.constant 0 : index
    %c0_34 = arith.constant 0 : index
    %44 = vector.load %arg13[%c0_33, %c0_34] : memref<1x4xf32, #tpu.memory_space<vmem>>, vector<1x4xf32>
    %45 = vector.broadcast %44 : vector<1x4xf32> to vector<8x4xf32>
    %46 = arith.addf %43, %45 : vector<8x4xf32>
    %c0_35 = arith.constant 0 : index
    %c0_36 = arith.constant 0 : index
    %47 = vector.load %arg14[%c0_35, %c0_36] : memref<8x4xf32, #tpu.memory_space<vmem>>, vector<8x4xf32>
    tpu.vector_store %arg14[%c0_35, %c0_36], %46 {strides = array<i32>} : memref<8x4xf32, #tpu.memory_space<vmem>>, vector<8x4xf32>,
    return
  }
  func.func @transform_0(%arg0: i32) -> (i32, i32) {
    %c0_i32 = arith.constant 0 : i32
    %c0_i32_0 = arith.constant 0 : i32
    return %arg0, %c0_i32 : i32, i32
  }
  func.func @transform_1(%arg0: i32) -> (i32, i32) {
    %c0_i32 = arith.constant 0 : i32
    %c0_i32_0 = arith.constant 0 : i32
    %c0_i32_1 = arith.constant 0 : i32
    return %c0_i32, %c0_i32_0 : i32, i32
  }
  func.func @transform_2(%arg0: i32) -> (i32, i32) {
    %c0_i32 = arith.constant 0 : i32
    %c0_i32_0 = arith.constant 0 : i32
    %c0_i32_1 = arith.constant 0 : i32
    return %c0_i32, %c0_i32_0 : i32, i32
  }
  func.func @transform_3(%arg0: i32) -> (i32, i32) {
    %c0_i32 = arith.constant 0 : i32
    %c0_i32_0 = arith.constant 0 : i32
    %c0_i32_1 = arith.constant 0 : i32
    return %c0_i32, %c0_i32_0 : i32, i32
  }
  func.func @transform_4(%arg0: i32) -> (i32, i32) {
    %c0_i32 = arith.constant 0 : i32
    %c0_i32_0 = arith.constant 0 : i32
    %c0_i32_1 = arith.constant 0 : i32
    return %c0_i32, %c0_i32_0 : i32, i32
  }
  func.func @transform_5(%arg0: i32) -> (i32, i32) {
    %c0_i32 = arith.constant 0 : i32
    %c0_i32_0 = arith.constant 0 : i32
    %c0_i32_1 = arith.constant 0 : i32
    return %c0_i32, %c0_i32_0 : i32, i32
  }
  func.func @transform_6(%arg0: i32) -> (i32, i32) {
    %c0_i32 = arith.constant 0 : i32
    %c0_i32_0 = arith.constant 0 : i32
    %c0_i32_1 = arith.constant 0 : i32
    return %c0_i32, %c0_i32_0 : i32, i32
  }
  func.func @transform_7(%arg0: i32) -> (i32, i32) {
    %c0_i32 = arith.constant 0 : i32
    %c0_i32_0 = arith.constant 0 : i32
    %c0_i32_1 = arith.constant 0 : i32
    return %c0_i32, %c0_i32_0 : i32, i32
  }
  func.func @transform_8(%arg0: i32) -> (i32, i32) {
    %c0_i32 = arith.constant 0 : i32
    %c0_i32_0 = arith.constant 0 : i32
    %c0_i32_1 = arith.constant 0 : i32
    return %c0_i32, %c0_i32_0 : i32, i32
  }
  func.func @transform_9(%arg0: i32) -> (i32, i32) {
    %c0_i32 = arith.constant 0 : i32
    %c0_i32_0 = arith.constant 0 : i32
    %c0_i32_1 = arith.constant 0 : i32
    return %c0_i32, %c0_i32_0 : i32, i32
  }
  func.func @transform_10(%arg0: i32) -> (i32, i32) {
    %c0_i32 = arith.constant 0 : i32
    %c0_i32_0 = arith.constant 0 : i32
    %c0_i32_1 = arith.constant 0 : i32
    return %c0_i32, %c0_i32_0 : i32, i32
  }
  func.func @transform_11(%arg0: i32) -> (i32, i32) {
    %c0_i32 = arith.constant 0 : i32
    %c0_i32_0 = arith.constant 0 : i32
    %c0_i32_1 = arith.constant 0 : i32
    return %c0_i32, %c0_i32_0 : i32, i32
  }
  func.func @transform_12(%arg0: i32) -> (i32, i32) {
    %c0_i32 = arith.constant 0 : i32
    %c0_i32_0 = arith.constant 0 : i32
    %c0_i32_1 = arith.constant 0 : i32
    return %c0_i32, %c0_i32_0 : i32, i32
  }
  func.func @transform_13(%arg0: i32) -> (i32, i32) {
    %c0_i32 = arith.constant 0 : i32
    %c0_i32_0 = arith.constant 0 : i32
    return %arg0, %c0_i32 : i32, i32
  }
}

</mosaic_0001>

<bundles_post_ra>
// kernel: model_regv4_forward.1
= control target key start
LH: loop header
LB: loop body
LE: loop exit
PB: predicated region body
PF: predicated region fallthrough
CT: control target
= control target key end

     0   :  { %18 = vsyncpa [#allocation3], 0  ;;  %s1370_s0 = inlined_call_operand.vmem [shape: f32[8,32], index: 0, kind: input, shape index: {}]   ;;  %s1371_s1 = inlined_call_operand.hbm [shape: bf16[32,128], index: 1, kind: input, shape index: {}]   ;;  %s1372_s2 = inlined_call_operand.vmem [shape: f32[1,128], index: 2, kind: input, shape index: {}]   ;;  %s1373_s3 = inlined_call_operand.vmem [shape: bf16[128,128], index: 3, kind: input, shape index: {}]   ;;  %s1374_s4 = inlined_call_operand.vmem [shape: f32[1,128], index: 4, kind: input, shape index: {}]   ;;  %s1375_s5 = inlined_call_operand.hbm [shape: bf16[128,128], index: 5, kind: input, shape index: {}]   ;;  %s1376_s6 = inlined_call_operand.vmem [shape: f32[1,128], index: 6, kind: input, shape index: {}]   ;;  %s1377_s7 = inlined_call_operand.hbm [shape: bf16[128,128], index: 7, kind: input, shape index: {}]   ;;  %s1378_s8 = inlined_call_operand.vmem [shape: f32[1,128], index: 8, kind: input, shape index: {}]   ;;  %s1379_s9 = inlined_call_operand.hbm [shape: bf16[128,128], index: 9, kind: input, shape index: {}]   ;;  %s1380_s10 = inlined_call_operand.vmem [shape: f32[1,128], index: 10, kind: input, shape index: {}]   ;;  %s1381_s11 = inlined_call_operand.vmem [shape: bf16[128,4], index: 11, kind: input, shape index: {}]   ;;  %s1382_s12 = inlined_call_operand.vmem [shape: f32[1,4], index: 12, kind: input, shape index: {}]   ;;  %s1383_s13 = inlined_call_operand.vmem [shape: f32[8,4], index: 13, kind: output, shape index: {}]  }
   0x1   :  { %19 = vsyncpa [#allocation5], 0 }
   0x2   :  { %20 = vsyncpa [#allocation8], 0  ;;  %s1092_s25 = smov [#allocation4]   ;;  %s1093_s27 = smov [#allocation2]  }
   0x3   :  { %s46_s26 = sshll.u32 %s1092_s25, 4  ;;  %s28_s28 = sshll.u32 %s1093_s27, 4  ;;  %s47_s26 = int_to_ptr.vmem [resolvable:$true] %s46_s26  ;;  %s1170_s28 = int_to_ptr.vmem [resolvable:$true] %s28_s28 }
   0x4   :  { %s998_s14 = scalar_lea.hbm %s1375_s5, 1024 }
   0x5   :  { %p999_p0 = scmp.ne.s32.totalorder %s1375_s5, %s998_s14  ;;  %p1002_p1 = scmp.lt.u32.totalorder %s998_s14, %s1375_s5 }
   0x7   :  { %p1004_p2 = pnand %p1002_p1, %p999_p0 }
   0x9   :  { %1007 = shalt.err (!%p1004_p2)
}
   0xa   :  { %s1008_s19 = scalar_lea.vmem %s47_s26, 1024  ;;  %p1013_p4 = scmp.lt.s32.totalorder %s47_s26, %s47_s26 }
   0xb   :  { %p1009_p3 = scmp.ne.s32.totalorder %s47_s26, %s1008_s19  ;;  %p1014_p5 = scmp.lt.s32.totalorder %s1008_s19, %s1008_s19 }
   0xd   :  { %p1015_p6 = por %p1014_p5, %p1013_p4 }
   0xf   :  { %p1016_p7 = pnand %p1015_p6, %p1009_p3 }
  0x11   :  { %1019 = shalt.err (!%p1016_p7)
}
  0x12   :  { %s1094_s20 = smov 64   ;;  %s1095_s21 = smov 4  }
  0x13   :  { %52 = dma.hbm_to_vmem [thread:$0]  %s1375_s5, 1024, %s47_s26, [#allocation5], %s1094_s20, %s1094_s20, %s1095_s21  }
  0x14   :  { %s1020_s27 = scalar_lea.hbm %s1371_s1, 256 }
  0x15   :  { %p1021_p8 = scmp.ne.s32.totalorder %s1371_s1, %s1020_s27  ;;  %p1024_p9 = scmp.lt.u32.totalorder %s1020_s27, %s1371_s1 }
  0x17   :  { %p1026_p10 = pnand %p1024_p9, %p1021_p8 }
  0x19   :  { %1029 = shalt.err (!%p1026_p10)
}
  0x1a   :  { %s1030_s16 = scalar_lea.vmem %s1170_s28, 256  ;;  %p1035_p12 = scmp.lt.s32.totalorder %s1170_s28, %s1170_s28 }
  0x1b   :  { %p1031_p11 = scmp.ne.s32.totalorder %s1170_s28, %s1030_s16  ;;  %p1036_p13 = scmp.lt.s32.totalorder %s1030_s16, %s1030_s16 }
  0x1d   :  { %p1037_p0 = por %p1036_p13, %p1035_p12 }
  0x1f   :  { %p1038_p1 = pnand %p1037_p0, %p1031_p11 }
  0x21   :  { %1041 = shalt.err (!%p1038_p1)
}
  0x22   :  { %34 = dma.hbm_to_vmem [thread:$0]  %s1371_s1, 256, %s1170_s28, [#allocation3], %s1094_s20, %s1094_s20, %s1095_s21  }
  0x23   :  { %s1096_s17 = smov [#allocation6]   ;;  %s1097_s19 = smov [#allocation7]  }
  0x24   :  { %s60_s18 = sshll.u32 %s1096_s17, 4  ;;  %s74_s22 = sshll.u32 %s1097_s19, 4  ;;  %s61_s18 = int_to_ptr.vmem [resolvable:$true] %s60_s18  ;;  %s1207_s22 = int_to_ptr.vmem [resolvable:$true] %s74_s22 }
  0x25   :  { %s1042_s25 = scalar_lea.hbm %s1377_s7, 1024 }
  0x26   :  { %p1043_p2 = scmp.ne.s32.totalorder %s1377_s7, %s1042_s25  ;;  %p1046_p3 = scmp.lt.u32.totalorder %s1042_s25, %s1377_s7 }
  0x28   :  { %p1048_p4 = pnand %p1046_p3, %p1043_p2 }
  0x2a   :  { %1051 = shalt.err (!%p1048_p4)
}
  0x2b   :  { %s1052_s1 = scalar_lea.vmem %s61_s18, 1024  ;;  %p1057_p6 = scmp.lt.s32.totalorder %s61_s18, %s61_s18 }
  0x2c   :  { %p1053_p5 = scmp.ne.s32.totalorder %s61_s18, %s1052_s1  ;;  %p1058_p7 = scmp.lt.s32.totalorder %s1052_s1, %s1052_s1 }
  0x2e   :  { %p1059_p8 = por %p1058_p7, %p1057_p6 }
  0x30   :  { %p1060_p9 = pnand %p1059_p8, %p1053_p5 }
  0x32   :  { %1063 = shalt.err (!%p1060_p9)
}
  0x33   :  { %66 = dma.hbm_to_vmem [thread:$0]  %s1377_s7, 1024, %s61_s18, [#allocation5], %s1094_s20, %s1094_s20, %s1095_s21  }
  0x34   :  { %s1064_s26 = scalar_lea.hbm %s1379_s9, 1024 }
  0x35   :  { %p1065_p10 = scmp.ne.s32.totalorder %s1379_s9, %s1064_s26  ;;  %p1068_p11 = scmp.lt.u32.totalorder %s1064_s26, %s1379_s9 }
  0x37   :  { %p1070_p12 = pnand %p1068_p11, %p1065_p10 }
  0x39   :  { %1073 = shalt.err (!%p1070_p12)
}
  0x3a   :  { %s1074_s25 = scalar_lea.vmem %s1207_s22, 1024  ;;  %p1079_p0 = scmp.lt.s32.totalorder %s1207_s22, %s1207_s22 }
  0x3b   :  { %p1075_p13 = scmp.ne.s32.totalorder %s1207_s22, %s1074_s25  ;;  %p1080_p1 = scmp.lt.s32.totalorder %s1074_s25, %s1074_s25 }
  0x3d   :  { %p1081_p2 = por %p1080_p1, %p1079_p0 }
  0x3f   :  { %p1082_p3 = pnand %p1081_p2, %p1075_p13 }
  0x41   :  { %1085 = shalt.err (!%p1082_p3)
}
  0x42   :  { %80 = dma.hbm_to_vmem [thread:$0]  %s1379_s9, 1024, %s1207_s22, [#allocation8], %s1094_s20, %s1094_s20, %s1095_s21  }
  0x43   :  { %1086 = dma.done.wait [#allocation3], 256  }
  0x44   :  { %1087 = vsyncadd [#allocation3], 4294967040 }
  0x45   :  { %1088 = dma.done.wait [#allocation5], 2048  }
  0x46   :  { %1089 = vsyncadd [#allocation5], 4294965248 }
  0x47   :  { %1090 = dma.done.wait [#allocation8], 1024  }
  0x48   :  { %1091 = vsyncadd [#allocation8], 4294966272  ;;  %v1098_v0 = vmov 0.0   ;;  %vm1099_vm0 = vmmov 0   ;;  %v956_v1 = vld [vmem:[#allocation2] sm:$0xff]   ;;  %v957_v2 = vld [vmem:[#allocation2 + $0x8] sm:$0xff]  }
  0x49   :  { %840 = vmatprep.subr.bf16.mxu0 %v1098_v0  ;;  %844 = vmatprep.mubr.msk.bf16.mxu0 %vm1099_vm0, %v1098_v0  ;;  %v100_v3 = vld [vmem:[%s1370_s0] sm:$0xff]  ;;  %v959_v6 = vld [vmem:[%s1373_s3 + $0x8] sm:$0xff]   ;;  %vm125_vm1 = vcmask 261120   ;;  %v960_v7 = vld [vmem:[%s1373_s3 + $0x10] sm:$0xff]   ;;  %vm734_vm2 = vcmask 31744  }
  0x4a   :  { %848 = vmatprep.subr.bf16.mxu1 %v1098_v0  ;;  %864 = vmatprep.mubr.msk.bf16.mxu1 %vm1099_vm0, %v1098_v0  ;;  %v958_v4 = vld [vmem:[%s1373_s3] sm:$0xff]   ;;  %v101_v5 = vpack.c.bf16 %v100_v3, %v100_v3  ;;  %v961_v8 = vld [vmem:[%s1373_s3 + $0x18] sm:$0xff]   ;;  %v963_v10 = vld [vmem:[%s1373_s3 + $0x28] sm:$0xff]  }
  0x4b   :  { %841 = vmatpush3.bf16.msra.mxu0 %v956_v1  ;;  %849 = vmatpush3.bf16.msra.mxu1 %v958_v4  ;;  %v962_v9 = vld [vmem:[%s1373_s3 + $0x20] sm:$0xff]   ;;  %v964_v11 = vld [vmem:[%s1373_s3 + $0x30] sm:$0xff]   ;;  %v965_v12 = vld [vmem:[%s1373_s3 + $0x38] sm:$0xff]  }
  0x4c   :  { %842 = vmatprep.subr.bf16.mxu0 %v1098_v0  ;;  %850 = vmatprep.subr.bf16.mxu1 %v1098_v0  ;;  %v966_v13 = vld [vmem:[#allocation4] sm:$0xff]   ;;  %v967_v14 = vld [vmem:[#allocation4 + $0x8] sm:$0xff]   ;;  %v968_v15 = vld [vmem:[#allocation4 + $0x10] sm:$0xff]  }
  0x4d   :  { %v969_v16 = vld [vmem:[#allocation4 + $0x18] sm:$0xff]   ;;  %v970_v17 = vld [vmem:[#allocation4 + $0x20] sm:$0xff]   ;;  %v971_v18 = vld [vmem:[#allocation4 + $0x28] sm:$0xff]  }
  0x4e   :  { %v743_v19 = vld [vmem:[%s1372_s2] ss:$0 sm:$0xff]  ;;  %v973_v28 = vld [vmem:[#allocation4 + $0x38] sm:$0xff]   ;;  %v974_v29 = vld [vmem:[#allocation6] sm:$0xff]  }
  0x4f   :  { %843 = vmatpush3.bf16.msra.mxu0 %v957_v2  ;;  %851 = vmatpush3.bf16.msra.mxu1 %v959_v6  ;;  %v972_v27 = vld [vmem:[#allocation4 + $0x30] sm:$0xff]   ;;  %v975_v30 = vld [vmem:[#allocation6 + $0x8] sm:$0xff]   ;;  %v977_v32 = vld [vmem:[#allocation6 + $0x18] sm:$0xff]  }
  0x50   :  { %868 = vmatprep.subr.bf16.mxu0 %v1098_v0  ;;  %852 = vmatprep.subr.bf16.mxu1 %v1098_v0  ;;  %v976_v31 = vld [vmem:[#allocation6 + $0x10] sm:$0xff]   ;;  %v978_v33 = vld [vmem:[#allocation6 + $0x20] sm:$0xff]   ;;  %v979_v34 = vld [vmem:[#allocation6 + $0x28] sm:$0xff]  }
  0x51   :  { %v747_v35 = vld [vmem:[%s1374_s4] ss:$0 sm:$0xff]  ;;  %v981_v44 = vld [vmem:[#allocation6 + $0x38] sm:$0xff]   ;;  %v982_v45 = vld [vmem:[#allocation7] sm:$0xff]  }
  0x52   :  { %845 = vmatmul.mubr.msk.bf16.vlgmr.msra.gmra.mrb[0].mxu0 %vm125_vm1, %v101_v5  ;;  %v980_v43 = vld [vmem:[#allocation6 + $0x30] sm:$0xff]   ;;  %v983_v46 = vld [vmem:[#allocation7 + $0x8] sm:$0xff]   ;;  %v985_v48 = vld [vmem:[#allocation7 + $0x18] sm:$0xff]  }
  0x53   :  { %884 = vmatprep.mubr.msk.bf16.mxu0 %vm1099_vm0, %v1098_v0  ;;  %853 = vmatpush3.bf16.msra.mxu1 %v960_v7  ;;  %v984_v47 = vld [vmem:[#allocation7 + $0x10] sm:$0xff]   ;;  %v986_v49 = vld [vmem:[#allocation7 + $0x20] sm:$0xff]   ;;  %v987_v50 = vld [vmem:[#allocation7 + $0x28] sm:$0xff]  }
  0x54   :  { %854 = vmatprep.subr.bf16.mxu1 %v1098_v0  ;;  %869 = vmatpush3.bf16.msra.mxu0 %v966_v13  ;;  %v756_v51 = vld [vmem:[%s1376_s6] ss:$0 sm:$0xff]  ;;  %v989_v60 = vld [vmem:[#allocation7 + $0x38] sm:$0xff]   ;;  %v992_v63 = vld [vmem:[%s1381_s11 + $0x10] sm:$0xff]  }
  0x55   :  { %870 = vmatprep.subr.bf16.mxu0 %v1098_v0  ;;  %v988_v59 = vld [vmem:[#allocation7 + $0x30] sm:$0xff]   ;;  %v991_v62 = vld [vmem:[%s1381_s11 + $0x8] sm:$0xff]   ;;  %v993_v1 = vld [vmem:[%s1381_s11 + $0x18] sm:$0xff]  }
  0x56   :  { %v990_v61 = vld [vmem:[%s1381_s11] sm:$0xff]   ;;  %v995_v3 = vld [vmem:[%s1381_s11 + $0x28] sm:$0xff]   ;;  %v997_v13 = vld [vmem:[%s1381_s11 + $0x38] sm:$0xff]  }
  0x57   :  { %855 = vmatpush3.bf16.msra.mxu1 %v961_v8  ;;  %v994_v2 = vld [vmem:[%s1381_s11 + $0x20] sm:$0xff]  }
  0x58   :  { %856 = vmatprep.subr.bf16.mxu1 %v1098_v0  ;;  %871 = vmatpush3.bf16.msra.mxu0 %v967_v14  ;;  %v765_v4 = vld [vmem:[%s1378_s8] ss:$0 sm:$0xff] }
  0x59   :  { %872 = vmatprep.subr.bf16.mxu0 %v1098_v0  ;;  %v774_v14 = vld [vmem:[%s1380_s10] ss:$0 sm:$0xff] }
  0x5b   :  { %857 = vmatpush3.bf16.msra.mxu1 %v962_v9 }
  0x5c   :  { %858 = vmatprep.subr.bf16.mxu1 %v1098_v0  ;;  %873 = vmatpush3.bf16.msra.mxu0 %v968_v15 }
  0x5d   :  { %874 = vmatprep.subr.bf16.mxu0 %v1098_v0 }
  0x5f   :  { %859 = vmatpush3.bf16.msra.mxu1 %v963_v10 }
  0x60   :  { %860 = vmatprep.subr.bf16.mxu1 %v1098_v0  ;;  %875 = vmatpush3.bf16.msra.mxu0 %v969_v16 }
  0x61   :  { %876 = vmatprep.subr.bf16.mxu0 %v1098_v0 }
  0x63   :  { %861 = vmatpush3.bf16.msra.mxu1 %v964_v11 }
  0x64   :  { %862 = vmatprep.subr.bf16.mxu1 %v1098_v0  ;;  %877 = vmatpush3.bf16.msra.mxu0 %v970_v17 }
  0x65   :  { %878 = vmatprep.subr.bf16.mxu0 %v1098_v0 }
  0x67   :  { %863 = vmatpush3.bf16.msra.mxu1 %v965_v12  ;;  %v996_v12 = vld [vmem:[%s1381_s11 + $0x30] sm:$0xff]  }
  0x68   :  { %888 = vmatprep.subr.bf16.mxu1 %v1098_v0  ;;  %879 = vmatpush3.bf16.msra.mxu0 %v971_v18 }
  0x69   :  { %880 = vmatprep.subr.bf16.mxu0 %v1098_v0 }
  0x6c   :  { %881 = vmatpush3.bf16.msra.mxu0 %v972_v27 }
  0x6d   :  { %882 = vmatprep.subr.bf16.mxu0 %v1098_v0 }
  0x70   :  { %883 = vmatpush3.bf16.msra.mxu0 %v973_v28 }
  0x71   :  { %908 = vmatprep.subr.bf16.mxu0 %v1098_v0 }
 0x125   :  { %v163_v20 = vpop.f32.mrb[0].mxu0 }
 0x126   :  { %v164_v21 = vadd.f32 %v743_v19, %v163_v20  ;;  %v846_v22 = vpop.f32.mrb[1].mxu0 }
 0x127   :  { %v166_v23 = vpop.f32.mrb[2].mxu0 }
 0x128   :  { %v169_v24 = vmax.f32 %v164_v21, 0.0  ;;  %v847_v25 = vpop.f32.mrb[3].mxu0 }
 0x12a   :  { %v170_v26 = vpack.c.bf16 %v169_v24, %v169_v24 }
 0x12c   :  { %865 = vmatmul.mubr.bf16.vlgmr.msra.gmra.mrb[0].mxu1 %v170_v26 }
 0x12d   :  { %904 = vmatprep.mubr.msk.bf16.mxu1 %vm1099_vm0, %v1098_v0  ;;  %889 = vmatpush3.bf16.msra.mxu1 %v974_v29 }
 0x12e   :  { %890 = vmatprep.subr.bf16.mxu1 %v1098_v0 }
 0x131   :  { %891 = vmatpush3.bf16.msra.mxu1 %v975_v30 }
 0x132   :  { %892 = vmatprep.subr.bf16.mxu1 %v1098_v0 }
 0x135   :  { %893 = vmatpush3.bf16.msra.mxu1 %v976_v31 }
 0x136   :  { %894 = vmatprep.subr.bf16.mxu1 %v1098_v0 }
 0x139   :  { %895 = vmatpush3.bf16.msra.mxu1 %v977_v32 }
 0x13a   :  { %896 = vmatprep.subr.bf16.mxu1 %v1098_v0 }
 0x13d   :  { %897 = vmatpush3.bf16.msra.mxu1 %v978_v33 }
 0x13e   :  { %898 = vmatprep.subr.bf16.mxu1 %v1098_v0 }
 0x141   :  { %899 = vmatpush3.bf16.msra.mxu1 %v979_v34 }
 0x142   :  { %900 = vmatprep.subr.bf16.mxu1 %v1098_v0 }
 0x145   :  { %901 = vmatpush3.bf16.msra.mxu1 %v980_v43 }
 0x146   :  { %902 = vmatprep.subr.bf16.mxu1 %v1098_v0 }
 0x149   :  { %903 = vmatpush3.bf16.msra.mxu1 %v981_v44 }
 0x14a   :  { %928 = vmatprep.subr.bf16.mxu1 %v1098_v0 }
 0x1ff   :  { %v276_v36 = vpop.f32.mrb[0].mxu1 }
 0x200   :  { %v277_v37 = vadd.f32 %v747_v35, %v276_v36  ;;  %v866_v38 = vpop.f32.mrb[1].mxu1 }
 0x201   :  { %v279_v39 = vpop.f32.mrb[2].mxu1 }
 0x202   :  { %v282_v40 = vmax.f32 %v277_v37, 0.0  ;;  %v867_v41 = vpop.f32.mrb[3].mxu1 }
 0x204   :  { %v283_v42 = vpack.c.bf16 %v282_v40, %v282_v40 }
 0x206   :  { %885 = vmatmul.mubr.bf16.vlgmr.msra.gmra.mrb[4].mxu0 %v283_v42 }
 0x207   :  { %924 = vmatprep.mubr.msk.bf16.mxu0 %vm1099_vm0, %v1098_v0  ;;  %909 = vmatpush3.bf16.msra.mxu0 %v982_v45 }
 0x208   :  { %910 = vmatprep.subr.bf16.mxu0 %v1098_v0 }
 0x20b   :  { %911 = vmatpush3.bf16.msra.mxu0 %v983_v46 }
 0x20c   :  { %912 = vmatprep.subr.bf16.mxu0 %v1098_v0 }
 0x20f   :  { %913 = vmatpush3.bf16.msra.mxu0 %v984_v47 }
 0x210   :  { %914 = vmatprep.subr.bf16.mxu0 %v1098_v0 }
 0x213   :  { %915 = vmatpush3.bf16.msra.mxu0 %v985_v48 }
 0x214   :  { %916 = vmatprep.subr.bf16.mxu0 %v1098_v0 }
 0x217   :  { %917 = vmatpush3.bf16.msra.mxu0 %v986_v49 }
 0x218   :  { %918 = vmatprep.subr.bf16.mxu0 %v1098_v0 }
 0x21b   :  { %919 = vmatpush3.bf16.msra.mxu0 %v987_v50 }
 0x21c   :  { %920 = vmatprep.subr.bf16.mxu0 %v1098_v0 }
 0x21f   :  { %921 = vmatpush3.bf16.msra.mxu0 %v988_v59 }
 0x220   :  { %922 = vmatprep.subr.bf16.mxu0 %v1098_v0 }
 0x223   :  { %923 = vmatpush3.bf16.msra.mxu0 %v989_v60 }
 0x2d9   :  { %v389_v52 = vpop.f32.mrb[4].mxu0 }
 0x2da   :  { %v390_v53 = vadd.f32 %v756_v51, %v389_v52  ;;  %v886_v54 = vpop.f32.mrb[5].mxu0 }
 0x2db   :  { %v392_v55 = vpop.f32.mrb[6].mxu0 }
 0x2dc   :  { %v395_v56 = vmax.f32 %v390_v53, 0.0  ;;  %v887_v57 = vpop.f32.mrb[7].mxu0 }
 0x2de   :  { %v396_v58 = vpack.c.bf16 %v395_v56, %v395_v56 }
 0x2e0   :  { %905 = vmatmul.mubr.bf16.vlgmr.msra.gmra.mrb[4].mxu1 %v396_v58 }
 0x2e1   :  { %944 = vmatprep.mubr.msk.bf16.mxu1 %vm1099_vm0, %v1098_v0  ;;  %929 = vmatpush3.bf16.msra.mxu1 %v990_v61 }
 0x2e2   :  { %930 = vmatprep.subr.bf16.mxu1 %v1098_v0 }
 0x2e5   :  { %931 = vmatpush3.bf16.msra.mxu1 %v991_v62 }
 0x2e6   :  { %932 = vmatprep.subr.bf16.mxu1 %v1098_v0 }
 0x2e9   :  { %933 = vmatpush3.bf16.msra.mxu1 %v992_v63 }
 0x2ea   :  { %934 = vmatprep.subr.bf16.mxu1 %v1098_v0 }
 0x2ed   :  { %935 = vmatpush3.bf16.msra.mxu1 %v993_v1 }
 0x2ee   :  { %936 = vmatprep.subr.bf16.mxu1 %v1098_v0 }
 0x2f1   :  { %937 = vmatpush3.bf16.msra.mxu1 %v994_v2 }
 0x2f2   :  { %938 = vmatprep.subr.bf16.mxu1 %v1098_v0 }
 0x2f5   :  { %939 = vmatpush3.bf16.msra.mxu1 %v995_v3 }
 0x2f6   :  { %940 = vmatprep.subr.bf16.mxu1 %v1098_v0 }
 0x2f9   :  { %941 = vmatpush3.bf16.msra.mxu1 %v996_v12 }
 0x2fa   :  { %942 = vmatprep.subr.bf16.mxu1 %v1098_v0  ;;  %v783_v0 = vld [vmem:[%s1382_s12] ss:$0 sm:$0xff] }
 0x2fd   :  { %943 = vmatpush3.bf16.msra.mxu1 %v997_v13 }
 0x3b3   :  { %v502_v5 = vpop.f32.mrb[4].mxu1 }
 0x3b4   :  { %v503_v6 = vadd.f32 %v765_v4, %v502_v5  ;;  %v906_v7 = vpop.f32.mrb[5].mxu1 }
 0x3b5   :  { %v505_v8 = vpop.f32.mrb[6].mxu1 }
 0x3b6   :  { %v508_v9 = vmax.f32 %v503_v6, 0.0  ;;  %v907_v10 = vpop.f32.mrb[7].mxu1 }
 0x3b8   :  { %v509_v11 = vpack.c.bf16 %v508_v9, %v508_v9 }
 0x3ba   :  { %925 = vmatmul.mubr.bf16.vlgmr.msra.gmra.mrb[8].mxu0 %v509_v11 }
 0x48d   :  { %v615_v15 = vpop.f32.mrb[8].mxu0 }
 0x48e   :  { %v616_v16 = vadd.f32 %v774_v14, %v615_v15  ;;  %v926_v17 = vpop.f32.mrb[9].mxu0 }
 0x48f   :  { %v618_v18 = vpop.f32.mrb[10].mxu0 }
 0x490   :  { %v621_v19 = vmax.f32 %v616_v16, 0.0  ;;  %v927_v20 = vpop.f32.mrb[11].mxu0 }
 0x492   :  { %v622_v21 = vpack.c.bf16 %v621_v19, %v621_v19 }
 0x494   :  { %945 = vmatmul.mubr.bf16.vlgmr.msra.gmra.mrb[8].mxu1 %v622_v21 }
 0x567   :  { %v728_v22 = vpop.f32.mrb[8].mxu1 }
 0x568   :  { %v729_v23 = vadd.f32 %v783_v0, %v728_v22  ;;  %v946_v24 = vpop.f32.mrb[9].mxu1 }
 0x569   :  { %v731_v25 = vpop.f32.mrb[10].mxu1 }
 0x56a   :  { %735 = vst.msk [vmem:[%s1383_s13] sm:$0xff] %vm734_vm2, %v729_v23  ;;  %v947_v26 = vpop.f32.mrb[11].mxu1 }
 0x56b   :  { %740 = vsyncpa [#allocation3], 1 }
 0x56c   :  { %741 = vsyncpa [#allocation5], 1 }
 0x56d   :  { %742 = vsyncpa [#allocation8], 1 }

</bundles_post_ra>
